<compile_context>
chip_gen: v7x
topology: tpu7x:2x2x1
jax: 0.10.0
libtpu: 0.0.40
codegen_flags: <defaults>
</compile_context>

<pallas_src>
import functools

import numpy as np

import jax
import jax.numpy as jnp
from jax import lax
from jax.experimental import pallas as pl
from jax.experimental.pallas import tpu as pltpu


def _upsample_conv_kernel(x_ref, w_ref, m_ref, b_ref, o_ref, bmat_ref, *, H, W, Cin, q):
    # x_ref:   (1, Cin, H*W + 2S)   flat, lane-padded input (one batch)
    # w_ref:   (4*Cout, D*D*Cin)    phase-folded weights
    # m_ref:   (D*D, H*W)           per-tap boundary masks (0/1)
    # b_ref:   (4*Cout, 1)          bias (replicated over phases)
    # o_ref:   (1, 4*Cout, H*W)     phase-major output (one batch)
    # bmat_ref:(D*D*Cin, H*W)       VMEM scratch: fused im2col RHS
    D = 2 * q + 1
    HW = H * W
    S = q * W + q

    # Assemble the im2col RHS: rows ordered (tap, cin), lanes = flattened spatial.
    for dy in range(-q, q + 1):
        for dx in range(-q, q + 1):
            t = (dy + q) * D + (dx + q)
            off = S + dy * W + dx                       # static, always >= 0
            window = x_ref[0, :, off:off + HW]          # (Cin, HW) shifted flat view
            mask = m_ref[t:t + 1, :]                    # (1, HW)
            bmat_ref[t * Cin:(t + 1) * Cin, :] = window * mask

    # One deep, lane-dense MXU matmul: (4*Cout, D*D*Cin) @ (D*D*Cin, HW).
    acc = jnp.dot(w_ref[...], bmat_ref[...], preferred_element_type=jnp.float32)
    acc = acc + b_ref[...]                              # broadcast (4*Cout, 1) over lanes
    o_ref[0] = acc.astype(o_ref.dtype)


@functools.partial(jax.jit, static_argnames=("kernel_size",))
def upsample_conv(x_nchw, weight, bias, *, kernel_size):
    """x_nchw: (N, Cin, H, W); weight: (Cout, Cin, K, K); bias: (Cout,)."""
    K = kernel_size
    assert K % 2 == 1
    p = (K - 1) // 2            # 'same' padding of the conv on the upsampled image
    q = (p + 1) // 2            # tap radius at original resolution
    D = 2 * q + 1               # distinct taps per spatial dim (union over phases)
    N, Cin, H, W = x_nchw.shape
    Cout = weight.shape[0]
    HW = H * W
    S = q * W + q               # lane padding so every tap window is a static slice

    dtype = jnp.float32         # TODO(synk): bf16 operands on v6e/v7x MXU

    # ---- input: flatten spatial onto lanes (free reshape) + small lane pad --------
    xf = x_nchw.astype(dtype).reshape(N, Cin, HW)
    xf = jnp.pad(xf, ((0, 0), (0, 0), (S, S)))          # (N, Cin, HW + 2S)

    # ---- phase-folded weights: (4*Cout, D*D*Cin) -----------------------------------
    w = weight.astype(dtype)
    w_all = jnp.zeros((4 * Cout, D * D * Cin), dtype)
    for ry in range(2):
        for rx in range(2):
            ph = ry * 2 + rx
            for kh in range(K):
                dy = (ry + kh - p) // 2                 # floor division
                for kw in range(K):
                    dx = (rx + kw - p) // 2
                    t = (dy + q) * D + (dx + q)
                    w_all = w_all.at[ph * Cout:(ph + 1) * Cout,
                                     t * Cin:(t + 1) * Cin].add(w[:, :, kh, kw])
    b_all = jnp.tile(bias.astype(dtype), 4).reshape(4 * Cout, 1)

    # ---- static per-tap boundary masks (exact, built on host at trace time) --------
    yy, xx = np.meshgrid(np.arange(H), np.arange(W), indexing="ij")
    m_np = np.zeros((D * D, HW), np.float32)
    for dy in range(-q, q + 1):
        for dx in range(-q, q + 1):
            t = (dy + q) * D + (dx + q)
            ok = (yy + dy >= 0) & (yy + dy < H) & (xx + dx >= 0) & (xx + dx < W)
            m_np[t] = ok.reshape(-1)
    masks = jnp.asarray(m_np, dtype)

    kernel = functools.partial(_upsample_conv_kernel, H=H, W=W, Cin=Cin, q=q)

    out_flat = pl.pallas_call(
        kernel,
        out_shape=jax.ShapeDtypeStruct((N, 4 * Cout, HW), dtype),
        grid_spec=pltpu.PrefetchScalarGridSpec(
            num_scalar_prefetch=0,
            grid=(N,),
            in_specs=[
                pl.BlockSpec((1, Cin, HW + 2 * S), lambda n: (n, 0, 0)),
                pl.BlockSpec((4 * Cout, D * D * Cin), lambda n: (0, 0)),
                pl.BlockSpec((D * D, HW), lambda n: (0, 0)),
                pl.BlockSpec((4 * Cout, 1), lambda n: (0, 0)),
            ],
            out_specs=pl.BlockSpec((1, 4 * Cout, HW), lambda n: (n, 0, 0)),
            scratch_shapes=[pltpu.VMEM((D * D * Cin, HW), dtype)],
        ),
        compiler_params=pltpu.CompilerParams(
            dimension_semantics=("parallel",),
            vmem_limit_bytes=32 * 1024 * 1024,
        ),
    )(xf, w_all, masks, b_all)
    # TODO(synk): for large H/W/C add a spatial grid axis (row tile + halo) so blocks fit
    # v7x's 64 MiB VMEM; whole-image blocks are fine at these sizes.

    # ---- pixel-shuffle the 4 phase planes into (N, Cout, 2H, 2W) --------------------
    # TODO(synk): fold this interleave into the kernel via strided stores to drop the
    # one remaining output-sized HBM round trip.
    out = out_flat.reshape(N, 2, 2, Cout, H, W)
    out = jnp.transpose(out, (0, 3, 4, 1, 5, 2))        # (N, Cout, H, ry, W, rx)
    return out.reshape(N, Cout, 2 * H, 2 * W).astype(x_nchw.dtype)


def _reference(x_nchw, weight, bias, *, kernel_size):
    pad = (kernel_size - 1) // 2
    xu = jnp.repeat(jnp.repeat(x_nchw, 2, axis=2), 2, axis=3)
    out = lax.conv_general_dilated(
        xu, weight, window_strides=(1, 1),
        padding=((pad, pad), (pad, pad)),
        dimension_numbers=("NCHW", "OIHW", "NCHW"),
        precision=lax.Precision.HIGHEST)
    return out + bias.reshape(1, -1, 1, 1)


if __name__ == "__main__":
    key = jax.random.PRNGKey(0)
    k_x, k_w, k_b = jax.random.split(key, 3)

    N, Cin, H, W = 2, 4, 16, 16
    Cout, K = 8, 3

    x = jax.random.normal(k_x, (N, Cin, H, W), dtype=jnp.float32)
    # Deterministic synthetic parameters (PyTorch shapes: (Cout, Cin, K, K), (Cout,)).
    fan_in = Cin * K * K
    bound = 1.0 / (fan_in ** 0.5)
    weight = jax.random.uniform(k_w, (Cout, Cin, K, K), jnp.float32, -bound, bound)
    bias = jax.random.uniform(k_b, (Cout,), jnp.float32, -bound, bound)

    out = upsample_conv(x, weight, bias, kernel_size=K)
    out = jax.block_until_ready(out)

    ref = _reference(x, weight, bias, kernel_size=K)
    assert out.shape == (N, Cout, 2 * H, 2 * W), out.shape
    assert jnp.allclose(out, ref, atol=1e-4, rtol=1e-4), "mismatch vs reference conv"

    print("KERNEL_OK")
</pallas_src>

<mosaic_0001>
module attributes {stable_mosaic.version = 11 : i64} {
  func.func @_upsample_conv_kernel(%arg0: i32, %arg1: memref<1x4x290xf32, #tpu.memory_space<vmem>>, %arg2: memref<32x36xf32, #tpu.memory_space<vmem>>, %arg3: memref<9x256xf32, #tpu.memory_space<vmem>>, %arg4: memref<32x1xf32, #tpu.memory_space<vmem>>, %arg5: memref<1x32x256xf32, #tpu.memory_space<vmem>>, %arg6: memref<36x256xf32, #tpu.memory_space<vmem>>) attributes {dimension_semantics = [#tpu.dimension_semantics<parallel>], iteration_bounds = array<i64: 2>, scalar_prefetch = 0 : i64, scratch_operands = 1 : i64, tpu.core_type = #tpu.core_type<tc>, window_params = [{transform_indices = @transform_0, window_bounds = array<i64: 1, 4, 290>}, {pipeline_mode = #tpu.pipeline_mode<synchronous>, transform_indices = @transform_1, window_bounds = array<i64: 32, 36>}, {pipeline_mode = #tpu.pipeline_mode<synchronous>, transform_indices = @transform_2, window_bounds = array<i64: 9, 256>}, {pipeline_mode = #tpu.pipeline_mode<synchronous>, transform_indices = @transform_3, window_bounds = array<i64: 32, 1>}, {transform_indices = @transform_4, window_bounds = array<i64: 1, 32, 256>}]} {
    %c0 = arith.constant 0 : index
    %c0_0 = arith.constant 0 : index
    %c0_1 = arith.constant 0 : index
    %0 = vector.load %arg1[%c0, %c0_0, %c0_1] : memref<1x4x290xf32, #tpu.memory_space<vmem>>, vector<1x4x256xf32>
    %1 = vector.shape_cast %0 : vector<1x4x256xf32> to vector<4x256xf32>
    %c0_2 = arith.constant 0 : index
    %c0_3 = arith.constant 0 : index
    %2 = vector.load %arg3[%c0_2, %c0_3] : memref<9x256xf32, #tpu.memory_space<vmem>>, vector<1x256xf32>
    %3 = vector.broadcast %2 : vector<1x256xf32> to vector<4x256xf32>
    %4 = arith.mulf %1, %3 : vector<4x256xf32>
    %c0_4 = arith.constant 0 : index
    %c0_5 = arith.constant 0 : index
    %5 = vector.load %arg6[%c0_4, %c0_5] : memref<36x256xf32, #tpu.memory_space<vmem>>, vector<4x256xf32>
    tpu.vector_store %arg6[%c0_4, %c0_5], %4 {strides = array<i32>} : memref<36x256xf32, #tpu.memory_space<vmem>>, vector<4x256xf32>,
    %c0_6 = arith.constant 0 : index
    %c0_7 = arith.constant 0 : index
    %c1 = arith.constant 1 : index
    %6 = vector.load %arg1[%c0_6, %c0_7, %c1] : memref<1x4x290xf32, #tpu.memory_space<vmem>>, vector<1x4x256xf32>
    %7 = vector.shape_cast %6 : vector<1x4x256xf32> to vector<4x256xf32>
    %c1_8 = arith.constant 1 : index
    %c0_9 = arith.constant 0 : index
    %8 = vector.load %arg3[%c1_8, %c0_9] : memref<9x256xf32, #tpu.memory_space<vmem>>, vector<1x256xf32>
    %9 = vector.broadcast %8 : vector<1x256xf32> to vector<4x256xf32>
    %10 = arith.mulf %7, %9 : vector<4x256xf32>
    %c4 = arith.constant 4 : index
    %c0_10 = arith.constant 0 : index
    %11 = vector.load %arg6[%c4, %c0_10] : memref<36x256xf32, #tpu.memory_space<vmem>>, vector<4x256xf32>
    tpu.vector_store %arg6[%c4, %c0_10], %10 {strides = array<i32>} : memref<36x256xf32, #tpu.memory_space<vmem>>, vector<4x256xf32>,
    %c0_11 = arith.constant 0 : index
    %c0_12 = arith.constant 0 : index
    %c2 = arith.constant 2 : index
    %12 = vector.load %arg1[%c0_11, %c0_12, %c2] : memref<1x4x290xf32, #tpu.memory_space<vmem>>, vector<1x4x256xf32>
    %13 = vector.shape_cast %12 : vector<1x4x256xf32> to vector<4x256xf32>
    %c2_13 = arith.constant 2 : index
    %c0_14 = arith.constant 0 : index
    %14 = vector.load %arg3[%c2_13, %c0_14] : memref<9x256xf32, #tpu.memory_space<vmem>>, vector<1x256xf32>
    %15 = vector.broadcast %14 : vector<1x256xf32> to vector<4x256xf32>
    %16 = arith.mulf %13, %15 : vector<4x256xf32>
    %c8 = arith.constant 8 : index
    %c0_15 = arith.constant 0 : index
    %17 = vector.load %arg6[%c8, %c0_15] : memref<36x256xf32, #tpu.memory_space<vmem>>, vector<4x256xf32>
    tpu.vector_store %arg6[%c8, %c0_15], %16 {strides = array<i32>} : memref<36x256xf32, #tpu.memory_space<vmem>>, vector<4x256xf32>,
    %c0_16 = arith.constant 0 : index
    %c0_17 = arith.constant 0 : index
    %c16 = arith.constant 16 : index
    %18 = vector.load %arg1[%c0_16, %c0_17, %c16] : memref<1x4x290xf32, #tpu.memory_space<vmem>>, vector<1x4x256xf32>
    %19 = vector.shape_cast %18 : vector<1x4x256xf32> to vector<4x256xf32>
    %c3 = arith.constant 3 : index
    %c0_18 = arith.constant 0 : index
    %20 = vector.load %arg3[%c3, %c0_18] : memref<9x256xf32, #tpu.memory_space<vmem>>, vector<1x256xf32>
    %21 = vector.broadcast %20 : vector<1x256xf32> to vector<4x256xf32>
    %22 = arith.mulf %19, %21 : vector<4x256xf32>
    %c12 = arith.constant 12 : index
    %c0_19 = arith.constant 0 : index
    %23 = vector.load %arg6[%c12, %c0_19] : memref<36x256xf32, #tpu.memory_space<vmem>>, vector<4x256xf32>
    tpu.vector_store %arg6[%c12, %c0_19], %22 {strides = array<i32>} : memref<36x256xf32, #tpu.memory_space<vmem>>, vector<4x256xf32>,
    %c0_20 = arith.constant 0 : index
    %c0_21 = arith.constant 0 : index
    %c17 = arith.constant 17 : index
    %24 = vector.load %arg1[%c0_20, %c0_21, %c17] : memref<1x4x290xf32, #tpu.memory_space<vmem>>, vector<1x4x256xf32>
    %25 = vector.shape_cast %24 : vector<1x4x256xf32> to vector<4x256xf32>
    %c4_22 = arith.constant 4 : index
    %c0_23 = arith.constant 0 : index
    %26 = vector.load %arg3[%c4_22, %c0_23] : memref<9x256xf32, #tpu.memory_space<vmem>>, vector<1x256xf32>
    %27 = vector.broadcast %26 : vector<1x256xf32> to vector<4x256xf32>
    %28 = arith.mulf %25, %27 : vector<4x256xf32>
    %c16_24 = arith.constant 16 : index
    %c0_25 = arith.constant 0 : index
    %29 = vector.load %arg6[%c16_24, %c0_25] : memref<36x256xf32, #tpu.memory_space<vmem>>, vector<4x256xf32>
    tpu.vector_store %arg6[%c16_24, %c0_25], %28 {strides = array<i32>} : memref<36x256xf32, #tpu.memory_space<vmem>>, vector<4x256xf32>,
    %c0_26 = arith.constant 0 : index
    %c0_27 = arith.constant 0 : index
    %c18 = arith.constant 18 : index
    %30 = vector.load %arg1[%c0_26, %c0_27, %c18] : memref<1x4x290xf32, #tpu.memory_space<vmem>>, vector<1x4x256xf32>
    %31 = vector.shape_cast %30 : vector<1x4x256xf32> to vector<4x256xf32>
    %c5 = arith.constant 5 : index
    %c0_28 = arith.constant 0 : index
    %32 = vector.load %arg3[%c5, %c0_28] : memref<9x256xf32, #tpu.memory_space<vmem>>, vector<1x256xf32>
    %33 = vector.broadcast %32 : vector<1x256xf32> to vector<4x256xf32>
    %34 = arith.mulf %31, %33 : vector<4x256xf32>
    %c20 = arith.constant 20 : index
    %c0_29 = arith.constant 0 : index
    %35 = vector.load %arg6[%c20, %c0_29] : memref<36x256xf32, #tpu.memory_space<vmem>>, vector<4x256xf32>
    tpu.vector_store %arg6[%c20, %c0_29], %34 {strides = array<i32>} : memref<36x256xf32, #tpu.memory_space<vmem>>, vector<4x256xf32>,
    %c0_30 = arith.constant 0 : index
    %c0_31 = arith.constant 0 : index
    %c32 = arith.constant 32 : index
    %36 = vector.load %arg1[%c0_30, %c0_31, %c32] : memref<1x4x290xf32, #tpu.memory_space<vmem>>, vector<1x4x256xf32>
    %37 = vector.shape_cast %36 : vector<1x4x256xf32> to vector<4x256xf32>
    %c6 = arith.constant 6 : index
    %c0_32 = arith.constant 0 : index
    %38 = vector.load %arg3[%c6, %c0_32] : memref<9x256xf32, #tpu.memory_space<vmem>>, vector<1x256xf32>
    %39 = vector.broadcast %38 : vector<1x256xf32> to vector<4x256xf32>
    %40 = arith.mulf %37, %39 : vector<4x256xf32>
    %c24 = arith.constant 24 : index
    %c0_33 = arith.constant 0 : index
    %41 = vector.load %arg6[%c24, %c0_33] : memref<36x256xf32, #tpu.memory_space<vmem>>, vector<4x256xf32>
    tpu.vector_store %arg6[%c24, %c0_33], %40 {strides = array<i32>} : memref<36x256xf32, #tpu.memory_space<vmem>>, vector<4x256xf32>,
    %c0_34 = arith.constant 0 : index
    %c0_35 = arith.constant 0 : index
    %c33 = arith.constant 33 : index
    %42 = vector.load %arg1[%c0_34, %c0_35, %c33] : memref<1x4x290xf32, #tpu.memory_space<vmem>>, vector<1x4x256xf32>
    %43 = vector.shape_cast %42 : vector<1x4x256xf32> to vector<4x256xf32>
    %c7 = arith.constant 7 : index
    %c0_36 = arith.constant 0 : index
    %44 = vector.load %arg3[%c7, %c0_36] : memref<9x256xf32, #tpu.memory_space<vmem>>, vector<1x256xf32>
    %45 = vector.broadcast %44 : vector<1x256xf32> to vector<4x256xf32>
    %46 = arith.mulf %43, %45 : vector<4x256xf32>
    %c28 = arith.constant 28 : index
    %c0_37 = arith.constant 0 : index
    %47 = vector.load %arg6[%c28, %c0_37] : memref<36x256xf32, #tpu.memory_space<vmem>>, vector<4x256xf32>
    tpu.vector_store %arg6[%c28, %c0_37], %46 {strides = array<i32>} : memref<36x256xf32, #tpu.memory_space<vmem>>, vector<4x256xf32>,
    %c0_38 = arith.constant 0 : index
    %c0_39 = arith.constant 0 : index
    %c34 = arith.constant 34 : index
    %48 = vector.load %arg1[%c0_38, %c0_39, %c34] : memref<1x4x290xf32, #tpu.memory_space<vmem>>, vector<1x4x256xf32>
    %49 = vector.shape_cast %48 : vector<1x4x256xf32> to vector<4x256xf32>
    %c8_40 = arith.constant 8 : index
    %c0_41 = arith.constant 0 : index
    %50 = vector.load %arg3[%c8_40, %c0_41] : memref<9x256xf32, #tpu.memory_space<vmem>>, vector<1x256xf32>
    %51 = vector.broadcast %50 : vector<1x256xf32> to vector<4x256xf32>
    %52 = arith.mulf %49, %51 : vector<4x256xf32>
    %c32_42 = arith.constant 32 : index
    %c0_43 = arith.constant 0 : index
    %53 = vector.load %arg6[%c32_42, %c0_43] : memref<36x256xf32, #tpu.memory_space<vmem>>, vector<4x256xf32>
    tpu.vector_store %arg6[%c32_42, %c0_43], %52 {strides = array<i32>} : memref<36x256xf32, #tpu.memory_space<vmem>>, vector<4x256xf32>,
    %c0_44 = arith.constant 0 : index
    %c0_45 = arith.constant 0 : index
    %54 = vector.load %arg2[%c0_44, %c0_45] : memref<32x36xf32, #tpu.memory_space<vmem>>, vector<32x36xf32>
    %c0_46 = arith.constant 0 : index
    %c0_47 = arith.constant 0 : index
    %55 = vector.load %arg6[%c0_46, %c0_47] : memref<36x256xf32, #tpu.memory_space<vmem>>, vector<36x256xf32>
    %cst = arith.constant dense<0.000000e+00> : vector<32x256xf32>
    %56 = tpu.matmul %54, %55, %cst {dimension_numbers = #tpu.dot_dimension_numbers<[1], [0], [0], [1], [0, 0, 1, 1], [], []>} : vector<32x36xf32>, vector<36x256xf32>, vector<32x256xf32> -> vector<32x256xf32>
    %c0_48 = arith.constant 0 : index
    %c0_49 = arith.constant 0 : index
    %57 = vector.load %arg4[%c0_48, %c0_49] : memref<32x1xf32, #tpu.memory_space<vmem>>, vector<32x1xf32>
    %58 = vector.broadcast %57 : vector<32x1xf32> to vector<32x256xf32>
    %59 = arith.addf %56, %58 : vector<32x256xf32>
    %c0_50 = arith.constant 0 : index
    %c0_51 = arith.constant 0 : index
    %c0_52 = arith.constant 0 : index
    %60 = vector.load %arg5[%c0_50, %c0_51, %c0_52] : memref<1x32x256xf32, #tpu.memory_space<vmem>>, vector<1x32x256xf32>
    %61 = vector.shape_cast %60 : vector<1x32x256xf32> to vector<32x256xf32>
    %62 = vector.shape_cast %59 : vector<32x256xf32> to vector<1x32x256xf32>
    tpu.vector_store %arg5[%c0_50, %c0_51, %c0_52], %62 {strides = array<i32>} : memref<1x32x256xf32, #tpu.memory_space<vmem>>, vector<1x32x256xf32>,
    return
  }
  func.func @transform_0(%arg0: i32) -> (i32, i32, i32) {
    %c0_i32 = arith.constant 0 : i32
    %c0_i32_0 = arith.constant 0 : i32
    %c0_i32_1 = arith.constant 0 : i32
    return %arg0, %c0_i32, %c0_i32_0 : i32, i32, i32
  }
  func.func @transform_1(%arg0: i32) -> (i32, i32) {
    %c0_i32 = arith.constant 0 : i32
    %c0_i32_0 = arith.constant 0 : i32
    %c0_i32_1 = arith.constant 0 : i32
    return %c0_i32, %c0_i32_0 : i32, i32
  }
  func.func @transform_2(%arg0: i32) -> (i32, i32) {
    %c0_i32 = arith.constant 0 : i32
    %c0_i32_0 = arith.constant 0 : i32
    %c0_i32_1 = arith.constant 0 : i32
    return %c0_i32, %c0_i32_0 : i32, i32
  }
  func.func @transform_3(%arg0: i32) -> (i32, i32) {
    %c0_i32 = arith.constant 0 : i32
    %c0_i32_0 = arith.constant 0 : i32
    %c0_i32_1 = arith.constant 0 : i32
    return %c0_i32, %c0_i32_0 : i32, i32
  }
  func.func @transform_4(%arg0: i32) -> (i32, i32, i32) {
    %c0_i32 = arith.constant 0 : i32
    %c0_i32_0 = arith.constant 0 : i32
    %c0_i32_1 = arith.constant 0 : i32
    return %arg0, %c0_i32, %c0_i32_0 : i32, i32, i32
  }
}

</mosaic_0001>

<bundles_post_ra>
// kernel: tile.8
= control target key start
LH: loop header
LB: loop body
LE: loop exit
PB: predicated region body
PF: predicated region fallthrough
CT: control target
= control target key end

     0   :  { %s22_s0 = inlined_call_operand.vmem [shape: f32[8], index: 0, kind: input, shape index: {}]   ;;  %s23_s1 = inlined_call_operand.vmem [shape: f32[4,8], index: 1, kind: output, shape index: {}]  }
   0x1   :  { %v4_v0 = vld [vmem:[%s22_s0] ss:$0 sm:$0xff] }
   0x2   :  { %5 = vst [vmem:[%s23_s1] sm:$0xf] %v4_v0 }

// kernel: tile.0
= control target key start
LH: loop header
LB: loop body
LE: loop exit
PB: predicated region body
PF: predicated region fallthrough
CT: control target
= control target key end

     0   :  { %s66_s8 = smov 125   ;;  %vm7_vm0 = vcmask 7168   ;;  %s67_s11 = smov 126   ;;  %s117_s0 = inlined_call_operand.vmem [shape: f32[4,8], index: 0, kind: input, shape index: {}]   ;;  %s118_s1 = inlined_call_operand.vmem [shape: f32[32,1], index: 1, kind: output, shape index: {}]  }
   0x1   :  { %v4_v0 = vld [vmem:[%s117_s0] sm:$0xf]  ;;  %s65_s0 = smov 127   ;;  %s68_s12 = smov 124  }
   0x2   :  { %5 = vst [vmem:[#allocation0] sm:$0xf] %v4_v0  ;;  %s69_s13 = smov 123   ;;  %s70_s14 = smov 122  }
   0x3   :  { %s71_s15 = smov 121  }
   0x9   :  { %v9_v1 = vld [vmem:[#allocation0] sm:$0xf]  }
   0xa   :  { %v21_v2 = vld [vmem:[#allocation0] sm:$0xf]   ;;  %10 = vrot.lane.b32.xlu0 %v9_v1, %s65_s0 }
   0xb   :  { %22 = vrot.lane.b32.xlu1 %v21_v2, %s66_s8  ;;  %v15_v3 = vld [vmem:[#allocation0] sm:$0xf]  }
   0xc   :  { %v27_v4 = vld [vmem:[#allocation0] sm:$0xf]  }
   0xd   :  { %v6_v5 = vld [vmem:[#allocation0] sm:$0xf]  }
   0xe   :  { %8 = vst.msk [vmem:[%s118_s1] ss:$8 sm:$0xf] %vm7_vm0, %v6_v5   ;;  %16 = vrot.lane.b32.xlu0 %v15_v3, %s67_s11  ;;  %v33_v6 = vld [vmem:[#allocation0] sm:$0xf]  }
   0xf   :  { %28 = vrot.lane.b32.xlu1 %v27_v4, %s68_s12  ;;  %v39_v7 = vld [vmem:[#allocation0] sm:$0xf]  }
  0x10   :  { %v45_v8 = vld [vmem:[#allocation0] sm:$0xf]  }
  0x12   :  { %34 = vrot.lane.b32.xlu0 %v33_v6, %s69_s13 }
  0x13   :  { %40 = vrot.lane.b32.xlu1 %v39_v7, %s70_s14 }
  0x16   :  { %46 = vrot.lane.b32.xlu0 %v45_v8, %s71_s15 }
  0x7c   :  { %v11_v9 = vpop.permute.xlu0 %10  }
  0x7d   :  { %v23_v10 = vpop.permute.xlu1 %22   ;;  %51 = vst.msk [vmem:[%s118_s1 + $0x1] ss:$8 sm:$0xf] %vm7_vm0, %v11_v9  }
  0x7e   :  { %53 = vst.msk [vmem:[%s118_s1 + $0x3] ss:$8 sm:$0xf] %vm7_vm0, %v23_v10  }
  0x80   :  { %v17_v11 = vpop.permute.xlu0 %16  }
  0x81   :  { %v29_v12 = vpop.permute.xlu1 %28   ;;  %52 = vst.msk [vmem:[%s118_s1 + $0x2] ss:$8 sm:$0xf] %vm7_vm0, %v17_v11  }
  0x82   :  { %54 = vst.msk [vmem:[%s118_s1 + $0x4] ss:$8 sm:$0xf] %vm7_vm0, %v29_v12  }
  0x84   :  { %v35_v13 = vpop.permute.xlu0 %34  }
  0x85   :  { %v41_v14 = vpop.permute.xlu1 %40   ;;  %55 = vst.msk [vmem:[%s118_s1 + $0x5] ss:$8 sm:$0xf] %vm7_vm0, %v35_v13  }
  0x86   :  { %56 = vst.msk [vmem:[%s118_s1 + $0x6] ss:$8 sm:$0xf] %vm7_vm0, %v41_v14  }
  0x88   :  { %v47_v15 = vpop.permute.xlu0 %46  }
  0x89   :  { %57 = vst.msk [vmem:[%s118_s1 + $0x7] ss:$8 sm:$0xf] %vm7_vm0, %v47_v15  }

// kernel: upsample_conv.1
= control target key start
LH: loop header
LB: loop body
LE: loop exit
PB: predicated region body
PF: predicated region fallthrough
CT: control target
= control target key end

     0   :  { %s862_s15 = smov 0   ;;  %s1028_s0 = inlined_call_operand.vmem [shape: f32[2,4,290], index: 0, kind: input, shape index: {}]   ;;  %s1029_s1 = inlined_call_operand.vmem [shape: f32[32,36], index: 1, kind: input, shape index: {}]   ;;  %s1030_s2 = inlined_call_operand.vmem [shape: f32[9,256], index: 2, kind: input, shape index: {}]   ;;  %s1031_s3 = inlined_call_operand.vmem [shape: f32[32,1], index: 3, kind: input, shape index: {}]   ;;  %s1032_s4 = inlined_call_operand.vmem [shape: f32[2,32,256], index: 4, kind: output, shape index: {}]  }
   0x1 LB: > { %s743_s16 = sadd.s32 4294967295, %s817_s15   ;;  %p747_p0 = scmp.ge.s32.totalorder %s817_s15, 1  ;;  %s817_s15 = sphi %s862_s15, %s14_s15  }
   0x2   : > { %p162_p1 = scmp.lt.s32.totalorder %s817_s15, 3 }
   0x4   : > { %p163_p2 = pnand %p747_p0, %p162_p1 }
   0x5   : > { %v201_v0 = vlaneseq (!%p163_p2)  ;;  %v753_v2 = vld [vmem:[%s1030_s2 + $0x3] ss:$8 sm:$0x3] (!%p163_p2)  ;;  %v752_v3 = vld [vmem:[%s1030_s2 + $0x2] ss:$8 sm:$0x3] (!%p163_p2) }
   0x6   : > { %166 = sbr.rel (%p163_p2) target bundleno = 529 (0x211), region = 36  ;;  %v754_v4 = vld [vmem:[%s1030_s2 + $0x4] ss:$8 sm:$0x3] (!%p163_p2)  ;;  %s819_s29 = smov (!%p163_p2), 16   ;;  %vm274_vm0 = vcmask (!%p163_p2), 15360  }
   0x7   : > { %v202_v1 = vshrl.u32 (!%p163_p2), %v201_v0, 7  ;;  %v751_v7 = vld [vmem:[%s1030_s2 + $0x1] ss:$8 sm:$0x3] (!%p163_p2)  ;;  %s820_s30 = smov (!%p163_p2), 2   ;;  %s821_s9 = smov (!%p163_p2), 17  }
   0x8   : > { %v755_v12 = vld [vmem:[%s1030_s2 + $0x5] ss:$8 sm:$0x3] (!%p163_p2)  ;;  %v756_v17 = vld [vmem:[%s1030_s2 + $0x6] ss:$8 sm:$0x3] (!%p163_p2) }
   0x9   : > { %v879_v5 = vsub.s32 (!%p163_p2), 0, %v202_v1  ;;  %v881_v6 = vsub.s32 (!%p163_p2), 1, %v202_v1  ;;  %v757_v26 = vld [vmem:[%s1030_s2 + $0x7] ss:$8 sm:$0x3] (!%p163_p2)  ;;  %s822_s10 = smov (!%p163_p2), 1  }
   0xa   : > { %v758_v27 = vld [vmem:[%s1030_s2 + $0x10] ss:$8 sm:$0x3] (!%p163_p2)  ;;  %s823_s11 = smov (!%p163_p2), 18   ;;  %s824_s12 = smov (!%p163_p2), 32   ;;  %vm392_vm1 = vcmask (!%p163_p2), 146432  }
   0xb   : > { %v304_v8 = vrot.slane (!%p163_p2), %v753_v2, %v879_v5  ;;  %v308_v9 = vrot.slane (!%p163_p2), %v753_v2, %v881_v6  ;;  %v265_v10 = vrot.slane (!%p163_p2), %v752_v3, %v879_v5  ;;  %v269_v11 = vrot.slane (!%p163_p2), %v752_v3, %v881_v6  ;;  %s825_s13 = smov (!%p163_p2), 33   ;;  %s826_s14 = smov (!%p163_p2), 34   ;;  %v199_v55 = vld [vmem:[%s1030_s2] ss:$8 sm:$0x3] (!%p163_p2) }
   0xc   : > { %v344_v13 = vrot.slane (!%p163_p2), %v754_v4, %v879_v5  ;;  %v348_v14 = vrot.slane (!%p163_p2), %v754_v4, %v881_v6  ;;  %v225_v15 = vrot.slane (!%p163_p2), %v751_v7, %v879_v5  ;;  %v229_v16 = vrot.slane (!%p163_p2), %v751_v7, %v881_v6  ;;  %p188_p3 = scmp.lt.s32.totalorder (!%p163_p2), %s743_s16, 1  ;;  %s827_s21 = smov (!%p163_p2), 126  }
   0xd   : > { %v309_v18 = vcombine.low %v304_v8, %v308_v9  ;;  %v270_v19 = vcombine.low %v265_v10, %v269_v11  ;;  %v383_v21 = vrot.slane %v755_v12, %v879_v5  ;;  %v387_v22 = vrot.slane %v755_v12, %v881_v6  ;;  %s828_s22 = smov 111   ;;  %s829_s25 = smov 96  }
   0xe   : > { %v349_v20 = vcombine.low %v344_v13, %v348_v14  ;;  %v230_v23 = vcombine.low %v225_v15, %v229_v16  ;;  %v423_v24 = vrot.slane %v756_v17, %v879_v5  ;;  %v427_v25 = vrot.slane %v756_v17, %v881_v6  ;;  %s1034_s16 = smov (!%p188_p3, %s743_s16), 1  ;;  %s830_s26 = smov 110  }
   0xf   : > { %310 = vrot.lane.b32.xlu1 %v309_v18, %s819_s29  ;;  %271 = vrot.lane.b32.xlu0 %v270_v19, %s820_s30  ;;  %v388_v28 = vcombine.low %v383_v21, %v387_v22  ;;  %v462_v29 = vrot.slane %v757_v26, %v879_v5  ;;  %v466_v30 = vrot.slane %v757_v26, %v881_v6  ;;  %s782_s17 = smul.u32 12, %s1034_s16  ;;  %vm234_vm2 = vcmask 7168   ;;  %s831_s27 = smov 127  }
  0x10   : > { %v428_v31 = vcombine.low %v423_v24, %v427_v25  ;;  %v502_v32 = vrot.slane %v758_v27, %v879_v5  ;;  %v506_v33 = vrot.slane %v758_v27, %v881_v6  ;;  %v204_v56 = vrot.slane %v199_v55, %v879_v5  ;;  %s832_s28 = smov 95   ;;  %s833_s29 = smov 112  }
  0x11   : > { %v467_v34 = vcombine.low %v462_v29, %v466_v30  ;;  %s924_s20 = scalar_lea.vmem %s1028_s0, %s782_s17  ;;  %v208_v57 = vrot.slane %v199_v55, %v881_v6  ;;  %vm471_vm3 = vcmask 269312   ;;  %vm313_vm4 = vcmask 130048   ;;  %s834_s30 = smov 94  }
  0x12   : > { %v507_v35 = vcombine.low %v502_v32, %v506_v33  ;;  %v258_v38 = vld [vmem:[%s924_s20 + $0x8] sm:$0xf]  ;;  %v930_v41 = vld [vmem:[%s924_s20] sm:$0xff]  ;;  %vm353_vm5 = vcmask 138240   ;;  %vm432_vm6 = vcmask 261120   ;;  %vm511_vm7 = vcmask 277504  }
  0x13   : > { %350 = vrot.lane.b32.xlu1 %v349_v20, %s821_s9  ;;  %231 = vrot.lane.b32.xlu0 %v230_v23, %s822_s10  ;;  %v337_v44 = vld [vmem:[%s924_s20 + $0x8] sm:$0xf]  ;;  %v209_v0 = vcombine.low %v204_v56, %v208_v57  ;;  %vm408_vm8 = vcmask 900096   ;;  %vm487_vm9 = vcmask 777216   ;;  %vm250_vm10 = vcmask 1039360   ;;  %s767_s23 = sshll.u32 %s1034_s16, 6 }
  0x14   : > { %v416_v52 = vld [vmem:[%s924_s20 + $0x8] sm:$0xf]  ;;  %vm289_vm11 = vcmask 1031168   ;;  %vm329_vm12 = vcmask 916480   ;;  %vm368_vm13 = vcmask 908288   ;;  %vm447_vm14 = vcmask 785408  }
  0x15   : > { %v211_v2 = vmul.f32 %v930_v41, %v209_v0  ;;  %v376_v6 = vld [vmem:[%s924_s20 + $0x8] sm:$0xf]  ;;  %vm526_vm15 = vcmask 769024  }
  0x16   : > { %v455_v13 = vld [vmem:[%s924_s20 + $0x8] sm:$0xf] }
  0x17   : > { %389 = vrot.lane.b32.xlu1 %v388_v28, %s823_s11  ;;  %429 = vrot.lane.b32.xlu0 %v428_v31, %s824_s12  ;;  %v213_v8 = vcombine.high %v211_v2, %v211_v2  ;;  %215 = vst [vmem:[#allocation2] sm:$0xf] %v211_v2  ;;  %v218_v14 = vld [vmem:[%s924_s20 + $0x8] sm:$0xf] }
  0x18   : > { %v297_v20 = vld [vmem:[%s924_s20 + $0x8] sm:$0xf] }
  0x19   : > { %216 = vst [vmem:[#allocation2 + $0x8] sm:$0xf] %v213_v8 }
  0x1b   : > { %468 = vrot.lane.b32.xlu0 %v467_v34, %s825_s13  ;;  %508 = vrot.lane.b32.xlu1 %v507_v35, %s826_s14 }
  0x81   : > { %v926_v36 = vpop.permute.xlu1 %310  ;;  %v272_v37 = vpop.permute.xlu0 %271 }
  0x82   : > { %v273_v39 = vrot.slane %v272_v37, 4  ;;  %v312_v60 = vrot.slane %v926_v36, 4 }
  0x84   : > { %v279_v40 = vmul.f32 %v273_v39, %v258_v38  ;;  %v275_v42 = vsel %vm274_vm0, %v273_v39, %v272_v37  ;;  %v314_v5 = vsel %vm313_vm4, %v312_v60, %v926_v36  ;;  %v318_v22 = vmul.f32 %v312_v60, %v297_v20  ;;  %v495_v37 = vld [vmem:[%s924_s20 + $0x8] sm:$0xf] }
  0x85   : > { %v351_v43 = vpop.permute.xlu1 %350  ;;  %v232_v45 = vpop.permute.xlu0 %231  ;;  %v935_v47 = vmul.f32 %v930_v41, %v275_v42  ;;  %v317_v10 = vmul.f32 %v314_v5, %v930_v41  ;;  %v835_v39 = vmov 0.0   ;;  %v836_v42 = vmov 0  }
  0x86   : > { %v352_v46 = vrot.slane %v351_v43, 4  ;;  %287 = vrot.lane.b32.xlu1 %v279_v40, %s827_s21  ;;  %v233_v49 = vrot.slane %v232_v45, 4  ;;  %v322_v27 = vcombine.low %v318_v22, %v318_v22  ;;  %655 = vmatprep.mubr.f32.mxu0 %v835_v39  ;;  %v548_v40 = vld [vmem:[%s1031_s3 + $0x8] sm:$0xff]  ;;  %vm584_vm0 = vcmask 1043456  }
  0x87   : > { %v282_v25 = vcombine.high %v935_v47, %v935_v47  ;;  %v321_v32 = vcombine.low %v317_v10, %v317_v10  ;;  %667 = vmatprep.mubr.f32.mxu1 %v835_v39  ;;  %810 = vset.pattern.permute.xlu1 %v836_v42 }
  0x88   : > { %v358_v48 = vmul.f32 %v352_v46, %v337_v44  ;;  %v235_v61 = vsel %vm234_vm2, %v233_v49, %v232_v45  ;;  %v354_v9 = vsel %vm353_vm5, %v352_v46, %v351_v43  ;;  %v239_v18 = vmul.f32 %v233_v49, %v218_v14  ;;  %809 = vset.pattern.permute.xlu0 %v836_v42  ;;  %v549_v43 = vld [vmem:[%s1031_s3 + $0x10] sm:$0xff]  ;;  %v550_v44 = vld [vmem:[%s1031_s3 + $0x18] sm:$0xff] }
  0x89   : > { %v390_v50 = vpop.permute.xlu1 %389  ;;  %v430_v51 = vpop.permute.xlu0 %429  ;;  %v238_v3 = vmul.f32 %v930_v41, %v235_v61  ;;  %v357_v12 = vmul.f32 %v354_v9, %v930_v41 }
  0x8a   : > { %v391_v53 = vrot.slane %v390_v50, 4  ;;  %v431_v54 = vrot.slane %v430_v51, 4  ;;  %366 = vrot.lane.b32.xlu0 %v358_v48, %s828_s22  ;;  %283 = vrot.lane.b32.xlu1 %v935_v47, %s827_s21  ;;  %v243_v23 = vcombine.low %v239_v18, %v239_v18 }
  0x8b   : > { %v242_v28 = vcombine.low %v238_v3, %v238_v3  ;;  %v361_v30 = vcombine.high %v357_v12, %v357_v12 }
  0x8c   : > { %v393_v58 = vsel %vm392_vm1, %v391_v53, %v390_v50  ;;  %v437_v59 = vmul.f32 %v431_v54, %v416_v52  ;;  %v397_v11 = vmul.f32 %v391_v53, %v376_v6  ;;  %v433_v15 = vsel %vm432_vm6, %v431_v54, %v430_v51 }
  0x8d   : > { %v948_v62 = vmul.f32 %v393_v58, %v930_v41  ;;  %v469_v63 = vpop.permute.xlu0 %468  ;;  %v436_v19 = vmul.f32 %v433_v15, %v930_v41  ;;  %v509_v24 = vpop.permute.xlu1 %508  ;;  %vm571_vm1 = vcmask 293888  }
  0x8e   : > { %v470_v1 = vrot.slane %v469_v63, 4  ;;  %445 = vrot.lane.b32.xlu0 %v437_v59, %s829_s25  ;;  %v401_v17 = vcombine.low %v397_v11, %v397_v11  ;;  %v510_v26 = vrot.slane %v509_v24, 4 }
  0x8f   : > { %404 = vrot.lane.b32.xlu1 %v948_v62, %s830_s26  ;;  %v440_v33 = vcombine.high %v436_v19, %v436_v19  ;;  %v400_v35 = vcombine.low %v948_v62, %v948_v62 }
  0x90   : > { %v472_v4 = vsel %vm471_vm3, %v470_v1, %v469_v63  ;;  %v476_v16 = vmul.f32 %v470_v1, %v455_v13  ;;  %v512_v29 = vsel %vm511_vm7, %v510_v26, %v509_v24  ;;  %v516_v38 = vmul.f32 %v510_v26, %v495_v37  ;;  %v534_v37 = vld [vmem:[%s1029_s1 + $0x8] sm:$0xff] }
  0x91   : > { %v475_v7 = vmul.f32 %v472_v4, %v930_v41  ;;  %v515_v31 = vmul.f32 %v512_v29, %v930_v41  ;;  %v547_v41 = vld [vmem:[%s1031_s3] sm:$0xff] }
  0x92   : > { %246 = vrot.lane.b32.xlu0 %v238_v3, %s831_s27  ;;  %v480_v21 = vcombine.low %v476_v16, %v476_v16 }
  0x93   : > { %483 = vrot.lane.b32.xlu1 %v475_v7, %s832_s28  ;;  %v519_v34 = vcombine.high %v515_v31, %v515_v31  ;;  %v479_v36 = vcombine.low %v475_v7, %v475_v7 }
  0x96   : > { %325 = vrot.lane.b32.xlu0 %v317_v10, %s833_s29 }
  0x97   : > { %362 = vrot.lane.b32.xlu1 %v357_v12, %s828_s22 }
  0x9a   : > { %406 = vrot.lane.b32.xlu0 %v401_v17, %s830_s26 }
  0x9b   : > { %441 = vrot.lane.b32.xlu1 %v436_v19, %s829_s25 }
  0x9e   : > { %485 = vrot.lane.b32.xlu0 %v480_v21, %s832_s28 }
  0x9f   : > { %248 = vrot.lane.b32.xlu1 %v243_v23, %s831_s27 }
  0xa2   : > { %285 = vrot.lane.b32.xlu0 %v282_v25, %s827_s21 }
  0xa3   : > { %327 = vrot.lane.b32.xlu1 %v322_v27, %s833_s29 }
  0xa6   : > { %244 = vrot.lane.b32.xlu0 %v242_v28, %s831_s27 }
  0xa7   : > { %364 = vrot.lane.b32.xlu1 %v361_v30, %s828_s22 }
  0xaa   : > { %323 = vrot.lane.b32.xlu0 %v321_v32, %s833_s29 }
  0xab   : > { %443 = vrot.lane.b32.xlu1 %v440_v33, %s829_s25 }
  0xae   : > { %402 = vrot.lane.b32.xlu0 %v400_v35, %s830_s26  ;;  %v535_v35 = vld [vmem:[%s1029_s1 + $0x10] sm:$0xff]  ;;  %s197_s26 = scalar_lea.vmem %s1032_s4, %s767_s23 }
  0xaf   : > { %522 = vrot.lane.b32.xlu1 %v519_v34, %s834_s30  ;;  %v533_v34 = vld [vmem:[%s1029_s1] sm:$0xff] }
  0xb2   : > { %481 = vrot.lane.b32.xlu0 %v479_v36, %s832_s28 }
  0xb3   : > { %520 = vrot.lane.b32.xlu1 %v515_v31, %s834_s30 }
  0xb6   : > { %524 = vrot.lane.b32.xlu0 %v516_v38, %s834_s30  ;;  %v536_v38 = vld [vmem:[%s1029_s1 + $0x18] sm:$0xff] }
  0xb7   : > { %558 = vperm.xlu1 %810, %v548_v40  }
  0xba   : > { %553 = vperm.xlu0 %809, %v547_v41  }
  0xbb   : > { %563 = vperm.xlu1 %810, %v549_v43  }
  0xbe   : > { %568 = vperm.xlu0 %809, %v550_v44  }
  0xf8   : > { %v288_v45 = vpop.permute.xlu1 %287 }
  0xfc   : > { %v367_v46 = vpop.permute.xlu0 %366  ;;  %v284_v47 = vpop.permute.xlu1 %283 }
 0x100   : > { %v446_v48 = vpop.permute.xlu0 %445 }
 0x101   : > { %v405_v49 = vpop.permute.xlu1 %404 }
 0x104   : > { %v247_v50 = vpop.permute.xlu0 %246 }
 0x105   : > { %v484_v51 = vpop.permute.xlu1 %483 }
 0x108   : > { %v326_v52 = vpop.permute.xlu0 %325 }
 0x109   : > { %v363_v53 = vpop.permute.xlu1 %362 }
 0x10c   : > { %v407_v54 = vpop.permute.xlu0 %406 }
 0x10d   : > { %v410_v55 = vsel %vm408_vm8, %v405_v49, %v407_v54  ;;  %v442_v56 = vpop.permute.xlu1 %441 }
 0x10e   : > { %414 = vst [vmem:[#allocation2 + $0x28] sm:$0xf0] %v410_v55 }
 0x110   : > { %v486_v57 = vpop.permute.xlu0 %485 }
 0x111   : > { %v489_v58 = vsel %vm487_vm9, %v484_v51, %v486_v57  ;;  %v249_v59 = vpop.permute.xlu1 %248 }
 0x112   : > { %493 = vst [vmem:[#allocation2 + $0x38] sm:$0xf0] %v489_v58  ;;  %v252_v60 = vsel %vm250_vm10, %v247_v50, %v249_v59 }
 0x113   : > { %256 = vst [vmem:[#allocation2 + $0x8] sm:$0xf0] %v252_v60 }
 0x114   : > { %v286_v61 = vpop.permute.xlu0 %285 }
 0x115   : > { %v290_v62 = vsel %vm289_vm11, %v284_v47, %v286_v61  ;;  %v291_v63 = vsel %vm289_vm11, %v286_v61, %v288_v45  ;;  %v328_v0 = vpop.permute.xlu1 %327 }
 0x116   : > { %294 = vst [vmem:[#allocation2 + $0x10] sm:$0xf] %v290_v62  ;;  %295 = vst [vmem:[#allocation2 + $0x18] sm:$0xf] %v291_v63  ;;  %v331_v1 = vsel %vm329_vm12, %v326_v52, %v328_v0 }
 0x117   : > { %335 = vst [vmem:[#allocation2 + $0x18] sm:$0xf0] %v331_v1 }
 0x118   : > { %v245_v2 = vpop.permute.xlu0 %244 }
 0x119   : > { %v251_v3 = vsel %vm250_vm10, %v245_v2, %v247_v50  ;;  %v365_v4 = vpop.permute.xlu1 %364 }
 0x11a   : > { %255 = vst [vmem:[#allocation2] sm:$0xf0] %v251_v3  ;;  %v369_v5 = vsel %vm368_vm13, %v363_v53, %v365_v4  ;;  %v370_v6 = vsel %vm368_vm13, %v365_v4, %v367_v46  ;;  %v538_v12 = vld [vmem:[#allocation2 + $0x8] sm:$0xff] }
 0x11b   : > { %373 = vst [vmem:[#allocation2 + $0x20] sm:$0xf] %v369_v5  ;;  %374 = vst [vmem:[#allocation2 + $0x28] sm:$0xf] %v370_v6 }
 0x11c   : > { %v324_v7 = vpop.permute.xlu0 %323 }
 0x11d   : > { %v330_v8 = vsel %vm329_vm12, %v324_v7, %v326_v52  ;;  %v444_v9 = vpop.permute.xlu1 %443 }
 0x11e   : > { %334 = vst [vmem:[#allocation2 + $0x10] sm:$0xf0] %v330_v8  ;;  %v448_v10 = vsel %vm447_vm14, %v442_v56, %v444_v9  ;;  %v449_v11 = vsel %vm447_vm14, %v444_v9, %v446_v48  ;;  %v540_v13 = vld [vmem:[#allocation2 + $0x18] sm:$0xff] }
 0x11f   : > { %452 = vst [vmem:[#allocation2 + $0x30] sm:$0xf] %v448_v10  ;;  %453 = vst [vmem:[#allocation2 + $0x38] sm:$0xf] %v449_v11  ;;  %v768_v14 = vpack.c.bf16 %v540_v13, %v538_v12 }
 0x120   : > { %v403_v15 = vpop.permute.xlu0 %402 }
 0x121   : > { %v409_v16 = vsel %vm408_vm8, %v403_v15, %v405_v49  ;;  %v523_v17 = vpop.permute.xlu1 %522  ;;  %769 = vmatprep.subr.bf16.mxu0 %v768_v14  ;;  %776 = vmatprep.subr.bf16.mxu1 %v768_v14  ;;  %v537_v21 = vld [vmem:[#allocation2] sm:$0xff] }
 0x122   : > { %413 = vst [vmem:[#allocation2 + $0x20] sm:$0xf0] %v409_v16  ;;  %v542_v25 = vld [vmem:[#allocation2 + $0x28] sm:$0xff] }
 0x124   : > { %v482_v18 = vpop.permute.xlu0 %481 }
 0x125   : > { %v488_v19 = vsel %vm487_vm9, %v482_v18, %v484_v51  ;;  %v521_v20 = vpop.permute.xlu1 %520  ;;  %v539_v22 = vld [vmem:[#allocation2 + $0x10] sm:$0xff] }
 0x126   : > { %492 = vst [vmem:[#allocation2 + $0x30] sm:$0xf0] %v488_v19  ;;  %v527_v23 = vsel %vm526_vm15, %v521_v20, %v523_v17  ;;  %v770_v24 = vpack.c.bf16 %v539_v22, %v537_v21  ;;  %v544_v26 = vld [vmem:[#allocation2 + $0x38] sm:$0xff] }
 0x127   : > { %531 = vst [vmem:[#allocation2 + $0x40] sm:$0xf] %v527_v23  ;;  %v772_v27 = vpack.c.bf16 %v544_v26, %v542_v25 }
 0x128   : > { %v525_v28 = vpop.permute.xlu0 %524  ;;  %771 = vmatpush1.bf16.msra.mxu0 %v770_v24  ;;  %779 = vmatpush1.bf16.msra.mxu1 %v770_v24 }
 0x129   : > { %v528_v29 = vsel %vm526_vm15, %v523_v17, %v525_v28  ;;  %773 = vmatprep.subr.bf16.mxu0 %v772_v27  ;;  %777 = vmatprep.subr.bf16.mxu1 %v772_v27  ;;  %v541_v30 = vld [vmem:[#allocation2 + $0x20] sm:$0xff] }
 0x12a   : > { %532 = vst [vmem:[#allocation2 + $0x48] sm:$0xf] %v528_v29 }
 0x12d   : > { %v543_v31 = vld [vmem:[#allocation2 + $0x30] sm:$0xff] }
 0x12e   : > { %v774_v32 = vpack.c.bf16 %v543_v31, %v541_v30  ;;  %v545_v36 = vld [vmem:[#allocation2 + $0x40] sm:$0xf] }
 0x130   : > { %775 = vmatpush1.bf16.msra.mxu0 %v774_v32  ;;  %780 = vmatpush1.bf16.msra.mxu1 %v774_v32 }
 0x131   : > { %v546_v33 = vld [vmem:[#allocation2 + $0x48] sm:$0xf] }
 0x132   : > { %759 = vmatprep.subr.msk.mxu0 %vm584_vm0, %v546_v33  ;;  %778 = vmatprep.subr.msk.mxu1 %vm584_vm0, %v546_v33 }
 0x134   : > { %760 = vmatpush1.msk.msra.mxu0 %vm584_vm0, %v545_v36  ;;  %781 = vmatpush1.msk.msra.mxu1 %vm584_vm0, %v545_v36 }
 0x135   : > { %761 = vmatmul.mubr.msk.f32.vlgmr.msra.gmra.mrb[0].mxu0 %vm571_vm1, %v533_v34  ;;  %763 = vmatmul.mubr.msk.f32.vlgmr.msra.gmra.mrb[0].mxu1 %vm571_vm1, %v535_v35 }
 0x136   : > { %661 = vmatprep.mubr.f32.mxu0 %v835_v39  ;;  %673 = vmatprep.mubr.f32.mxu1 %v835_v39  ;;  %v559_v40 = vpop.permute.xlu1 %558 }
 0x139   : > { %762 = vmatmul.mubr.msk.f32.gmra.mrb[2].mxu0 %vm571_vm1, %v534_v37  ;;  %764 = vmatmul.mubr.msk.f32.gmra.mrb[2].mxu1 %vm571_vm1, %v536_v38  ;;  %v554_v41 = vpop.permute.xlu0 %553 }
 0x13a   : > { %v564_v42 = vpop.permute.xlu1 %563 }
 0x13d   : > { %v569_v50 = vpop.permute.xlu0 %568 }
 0x208   : > { %v657_v43 = vpop.f32.mrb[0].mxu0  ;;  %v669_v39 = vpop.f32.mrb[0].mxu1 }
 0x209   : > { %v658_v44 = vadd.f32 %v657_v43, %v554_v41  ;;  %v670_v45 = vadd.f32 %v669_v39, %v564_v42  ;;  %v659_v46 = vpop.f32.mrb[1].mxu0  ;;  %v671_v47 = vpop.f32.mrb[1].mxu1 }
 0x20a   : > { %v660_v48 = vadd.f32 %v659_v46, %v554_v41  ;;  %v672_v49 = vadd.f32 %v671_v47, %v564_v42 }
 0x20b   : > { %680 = vst [vmem:[%s197_s26] sm:$0xff] %v658_v44  ;;  %684 = vst [vmem:[%s197_s26 + $0x20] sm:$0xff] %v670_v45 }
 0x20c   : > { %681 = vst [vmem:[%s197_s26 + $0x8] sm:$0xff] %v660_v48  ;;  %685 = vst [vmem:[%s197_s26 + $0x28] sm:$0xff] %v672_v49  ;;  %v663_v51 = vpop.f32.mrb[2].mxu0  ;;  %v675_v52 = vpop.f32.mrb[2].mxu1 }
 0x20d   : > { %v664_v53 = vadd.f32 %v663_v51, %v559_v40  ;;  %v676_v54 = vadd.f32 %v675_v52, %v569_v50  ;;  %v665_v55 = vpop.f32.mrb[3].mxu0  ;;  %v677_v56 = vpop.f32.mrb[3].mxu1 }
 0x20e   : > { %v666_v57 = vadd.f32 %v665_v55, %v559_v40  ;;  %v678_v58 = vadd.f32 %v677_v56, %v569_v50 }
 0x20f   : > { %682 = vst [vmem:[%s197_s26 + $0x10] sm:$0xff] %v664_v53  ;;  %686 = vst [vmem:[%s197_s26 + $0x30] sm:$0xff] %v676_v54 }
 0x210   : > { %683 = vst [vmem:[%s197_s26 + $0x18] sm:$0xff] %v666_v57  ;;  %687 = vst [vmem:[%s197_s26 + $0x38] sm:$0xff] %v678_v58 }
 0x211 PF: > { %s14_s15 = sadd.s32 1, %s817_s15  }
 0x212   : > { %p11_p4 = scmp.ge.s32.totalorder %s14_s15, 4  }
 0x214   :  { %13 = sbr.rel (!%p11_p4) target bundleno = 1 (0x1), region = 74 }

</bundles_post_ra>
